<compile_context>
chip_gen: v7x
topology: tpu7x:2x2x1
jax: 0.10.0
libtpu: 0.0.40
codegen_flags: <defaults>
</compile_context>

<pallas_src>
import functools

import jax
import jax.numpy as jnp
from jax.experimental import pallas as pl
from jax.experimental.pallas import tpu as pltpu

HIDDEN = 20              # fixed hidden width from the torch module
NEG_SLOPE = 0.01         # default negative_slope of nn.LeakyReLU()
LANE = 128               # TPU lane width
SUBLANE = 8              # f32 sublane width


def _round_up(n, m):
    return ((n + m - 1) // m) * m


def mlp_kernel(x_ref, w1_ref, b1_ref, w2_ref, b2_ref, o_ref):
    # Fused MLP tile: (X @ W1 + b1) -> LeakyReLU -> (@ W2 + b2).
    # All operands live in VMEM; both matmuls run on the MXU with f32 accumulate.
    x = x_ref[...]
    h = jnp.dot(x, w1_ref[...], preferred_element_type=jnp.float32) + b1_ref[...]
    h = jnp.maximum(h, NEG_SLOPE * h)               # LeakyReLU (slope < 1)
    o = jnp.dot(h, w2_ref[...], preferred_element_type=jnp.float32) + b2_ref[...]
    o_ref[...] = o.astype(o_ref.dtype)


def prepare_params(w1, b1, w2, b2):
    """Pad the (tiny) weights ONCE at init so the hidden dim is lane-dense.

    Zero padding is mathematically inert (extra hidden lanes contribute 0 to
    the second matmul). Returns (w1_p, b1_p, w2_p, b2_p)."""
    hidden = w1.shape[1]
    hid_pad = _round_up(hidden, LANE)
    w1_p = jnp.pad(w1, ((0, 0), (0, hid_pad - hidden)))
    b1_p = jnp.pad(b1, (0, hid_pad - hidden)).reshape(1, hid_pad)
    w2_p = jnp.pad(w2, ((0, hid_pad - hidden), (0, 0)))
    b2_p = b2.reshape(1, -1)
    return w1_p, b1_p, w2_p, b2_p


@functools.partial(jax.jit, static_argnames=("block_b",))
def mlp_forward(x, w1_p, b1_p, w2_p, b2_p, *, block_b=2048):
    """x: [B, in_size]; padded params from prepare_params() -> [B, out_size]."""
    B, in_size = x.shape
    hid_pad = w1_p.shape[1]
    out_size = w2_p.shape[1]

    # Batch tile: multiple of 8 sublanes; for large B keep >= 2 grid steps so
    # both v7x TensorCores get work; cap at block_b (multiple of 8) for
    # pipelining granularity.  VMEM stays far under limits (~1 MiB at tb=2048).
    tb = min(_round_up(block_b, SUBLANE),
             _round_up(max(pl.cdiv(B, 2), 1), SUBLANE))
    tb = max(tb, SUBLANE)
    grid = (pl.cdiv(B, tb),)   # ragged final tile handled by Pallas masking

    flops = 2 * B * (in_size * hid_pad + hid_pad * out_size)
    bytes_accessed = 4 * (B * (in_size + out_size)
                          + w1_p.size + b1_p.size + w2_p.size + b2_p.size)

    return pl.pallas_call(
        mlp_kernel,
        out_shape=jax.ShapeDtypeStruct((B, out_size), x.dtype),
        grid=grid,
        in_specs=[
            pl.BlockSpec((tb, in_size), lambda i: (i, 0)),        # X: batch-tiled
            pl.BlockSpec((in_size, hid_pad), lambda i: (0, 0)),   # W1: resident
            pl.BlockSpec((1, hid_pad), lambda i: (0, 0)),         # b1: resident
            pl.BlockSpec((hid_pad, out_size), lambda i: (0, 0)),  # W2: resident
            pl.BlockSpec((1, out_size), lambda i: (0, 0)),        # b2: resident
        ],
        out_specs=pl.BlockSpec((tb, out_size), lambda i: (i, 0)), # O: batch-tiled
        compiler_params=pltpu.CompilerParams(
            dimension_semantics=("parallel",),                    # v7x: 2 TCs split batch
        ),
        cost_estimate=pl.CostEstimate(
            flops=flops, transcendentals=0, bytes_accessed=bytes_accessed),
    )(x, w1_p, b1_p, w2_p, b2_p)


def reference_forward(x, w1, b1, w2, b2):
    h = x @ w1 + b1
    h = jnp.where(h > 0, h, NEG_SLOPE * h)
    return h @ w2 + b2


if __name__ == "__main__":
    # Small shapes consistent with the module: Model(in_size=32, out_size=16)
    B, in_size, out_size = 8, 32, 16

    key = jax.random.PRNGKey(0)
    kx, kw1, kb1, kw2, kb2, kx2 = jax.random.split(key, 6)

    x = jax.random.normal(kx, (B, in_size), dtype=jnp.float32)

    # Deterministic params (uniform in +/- 1/sqrt(fan_in), like torch Linear default)
    lim1 = 1.0 / jnp.sqrt(jnp.float32(in_size))
    lim2 = 1.0 / jnp.sqrt(jnp.float32(HIDDEN))
    w1 = jax.random.uniform(kw1, (in_size, HIDDEN), jnp.float32, -lim1, lim1)
    b1 = jax.random.uniform(kb1, (HIDDEN,), jnp.float32, -lim1, lim1)
    w2 = jax.random.uniform(kw2, (HIDDEN, out_size), jnp.float32, -lim2, lim2)
    b2 = jax.random.uniform(kb2, (out_size,), jnp.float32, -lim2, lim2)

    # Pad weights once at "init" (hoisted out of the per-call path).
    w1_p, b1_p, w2_p, b2_p = prepare_params(w1, b1, w2, b2)

    # Toy-shape check (single batch tile).
    out = mlp_forward(x, w1_p, b1_p, w2_p, b2_p)
    jax.block_until_ready(out)
    ref = reference_forward(x, w1, b1, w2, b2)
    assert out.shape == (B, out_size)
    assert jnp.allclose(out, ref, atol=1e-5, rtol=1e-5), "mismatch vs reference (B=8)"

    # Larger batch check: exercises grid > 1 and a ragged final tile (no padding).
    B2 = 1030
    x2 = jax.random.normal(kx2, (B2, in_size), dtype=jnp.float32)
    out2 = mlp_forward(x2, w1_p, b1_p, w2_p, b2_p)
    jax.block_until_ready(out2)
    ref2 = reference_forward(x2, w1, b1, w2, b2)
    assert out2.shape == (B2, out_size)
    assert jnp.allclose(out2, ref2, atol=1e-5, rtol=1e-5), "mismatch vs reference (B=1030)"

    print("KERNEL_OK")
</pallas_src>

<mosaic_0001>
module attributes {stable_mosaic.version = 11 : i64} {
  func.func @mlp_kernel(%arg0: i32, %arg1: memref<8x32xf32, #tpu.memory_space<vmem>>, %arg2: memref<32x128xf32, #tpu.memory_space<vmem>>, %arg3: memref<1x128xf32, #tpu.memory_space<vmem>>, %arg4: memref<128x16xf32, #tpu.memory_space<vmem>>, %arg5: memref<1x16xf32, #tpu.memory_space<vmem>>, %arg6: memref<8x16xf32, #tpu.memory_space<vmem>>) attributes {dimension_semantics = [#tpu.dimension_semantics<parallel>], iteration_bounds = array<i64: 1>, scalar_prefetch = 0 : i64, scratch_operands = 0 : i64, tpu.core_type = #tpu.core_type<tc>, window_params = [{transform_indices = @transform_0, window_bounds = array<i64: 8, 32>}, {pipeline_mode = #tpu.pipeline_mode<synchronous>, transform_indices = @transform_1, window_bounds = array<i64: 32, 128>}, {pipeline_mode = #tpu.pipeline_mode<synchronous>, transform_indices = @transform_2, window_bounds = array<i64: 1, 128>}, {pipeline_mode = #tpu.pipeline_mode<synchronous>, transform_indices = @transform_3, window_bounds = array<i64: 128, 16>}, {pipeline_mode = #tpu.pipeline_mode<synchronous>, transform_indices = @transform_4, window_bounds = array<i64: 1, 16>}, {transform_indices = @transform_5, window_bounds = array<i64: 8, 16>}]} {
    %c0 = arith.constant 0 : index
    %c0_0 = arith.constant 0 : index
    %0 = vector.load %arg1[%c0, %c0_0] : memref<8x32xf32, #tpu.memory_space<vmem>>, vector<8x32xf32>
    %c0_1 = arith.constant 0 : index
    %c0_2 = arith.constant 0 : index
    %1 = vector.load %arg2[%c0_1, %c0_2] : memref<32x128xf32, #tpu.memory_space<vmem>>, vector<32x128xf32>
    %cst = arith.constant dense<0.000000e+00> : vector<8x128xf32>
    %2 = tpu.matmul %0, %1, %cst {dimension_numbers = #tpu.dot_dimension_numbers<[1], [0], [0], [1], [0, 0, 1, 1], [], []>} : vector<8x32xf32>, vector<32x128xf32>, vector<8x128xf32> -> vector<8x128xf32>
    %c0_3 = arith.constant 0 : index
    %c0_4 = arith.constant 0 : index
    %3 = vector.load %arg3[%c0_3, %c0_4] : memref<1x128xf32, #tpu.memory_space<vmem>>, vector<1x128xf32>
    %4 = vector.broadcast %3 : vector<1x128xf32> to vector<8x128xf32>
    %5 = arith.addf %2, %4 : vector<8x128xf32>
    %cst_5 = arith.constant 0.00999999977 : f32
    %6 = vector.broadcast %cst_5 : f32 to vector<8x128xf32>
    %7 = arith.mulf %6, %5 : vector<8x128xf32>
    %8 = arith.maximumf %5, %7 : vector<8x128xf32>
    %c0_6 = arith.constant 0 : index
    %c0_7 = arith.constant 0 : index
    %9 = vector.load %arg4[%c0_6, %c0_7] : memref<128x16xf32, #tpu.memory_space<vmem>>, vector<128x16xf32>
    %cst_8 = arith.constant dense<0.000000e+00> : vector<8x16xf32>
    %10 = tpu.matmul %8, %9, %cst_8 {dimension_numbers = #tpu.dot_dimension_numbers<[1], [0], [0], [1], [0, 0, 1, 1], [], []>} : vector<8x128xf32>, vector<128x16xf32>, vector<8x16xf32> -> vector<8x16xf32>
    %c0_9 = arith.constant 0 : index
    %c0_10 = arith.constant 0 : index
    %11 = vector.load %arg5[%c0_9, %c0_10] : memref<1x16xf32, #tpu.memory_space<vmem>>, vector<1x16xf32>
    %12 = vector.broadcast %11 : vector<1x16xf32> to vector<8x16xf32>
    %13 = arith.addf %10, %12 : vector<8x16xf32>
    %c0_11 = arith.constant 0 : index
    %c0_12 = arith.constant 0 : index
    %14 = vector.load %arg6[%c0_11, %c0_12] : memref<8x16xf32, #tpu.memory_space<vmem>>, vector<8x16xf32>
    tpu.vector_store %arg6[%c0_11, %c0_12], %13 {strides = array<i32>} : memref<8x16xf32, #tpu.memory_space<vmem>>, vector<8x16xf32>,
    return
  }
  func.func @transform_0(%arg0: i32) -> (i32, i32) {
    %c0_i32 = arith.constant 0 : i32
    %c0_i32_0 = arith.constant 0 : i32
    return %arg0, %c0_i32 : i32, i32
  }
  func.func @transform_1(%arg0: i32) -> (i32, i32) {
    %c0_i32 = arith.constant 0 : i32
    %c0_i32_0 = arith.constant 0 : i32
    %c0_i32_1 = arith.constant 0 : i32
    return %c0_i32, %c0_i32_0 : i32, i32
  }
  func.func @transform_2(%arg0: i32) -> (i32, i32) {
    %c0_i32 = arith.constant 0 : i32
    %c0_i32_0 = arith.constant 0 : i32
    %c0_i32_1 = arith.constant 0 : i32
    return %c0_i32, %c0_i32_0 : i32, i32
  }
  func.func @transform_3(%arg0: i32) -> (i32, i32) {
    %c0_i32 = arith.constant 0 : i32
    %c0_i32_0 = arith.constant 0 : i32
    %c0_i32_1 = arith.constant 0 : i32
    return %c0_i32, %c0_i32_0 : i32, i32
  }
  func.func @transform_4(%arg0: i32) -> (i32, i32) {
    %c0_i32 = arith.constant 0 : i32
    %c0_i32_0 = arith.constant 0 : i32
    %c0_i32_1 = arith.constant 0 : i32
    return %c0_i32, %c0_i32_0 : i32, i32
  }
  func.func @transform_5(%arg0: i32) -> (i32, i32) {
    %c0_i32 = arith.constant 0 : i32
    %c0_i32_0 = arith.constant 0 : i32
    return %arg0, %c0_i32 : i32, i32
  }
}

</mosaic_0001>

<bundles_post_ra>
// kernel: mlp_forward.1
= control target key start
LH: loop header
LB: loop body
LE: loop exit
PB: predicated region body
PF: predicated region fallthrough
CT: control target
= control target key end

     0   :  { %v347_v3 = vmov 0.0|0.0   ;;  %vm348_vm0 = vmmov 0   ;;  %v349_v6 = vmov 0.0   ;;  %s462_s0 = inlined_call_operand.vmem [shape: f32[8,32], index: 0, kind: input, shape index: {}]   ;;  %s463_s1 = inlined_call_operand.vmem [shape: f32[32,128], index: 1, kind: input, shape index: {}]   ;;  %s464_s2 = inlined_call_operand.vmem [shape: f32[1,128], index: 2, kind: input, shape index: {}]   ;;  %s465_s3 = inlined_call_operand.vmem [shape: f32[128,16], index: 3, kind: input, shape index: {}]   ;;  %s466_s4 = inlined_call_operand.vmem [shape: f32[1,16], index: 4, kind: input, shape index: {}]   ;;  %s467_s5 = inlined_call_operand.hbm [shape: f32[8,16], index: 5, kind: output, shape index: {}]  }
   0x1   :  { %v22_v0 = vld [vmem:[%s463_s1] sm:$0xff]  ;;  %v23_v1 = vld [vmem:[%s463_s1 + $0x8] sm:$0xff]  ;;  %v24_v2 = vld [vmem:[%s463_s1 + $0x10] sm:$0xff]  ;;  %289 = vmatprep.subr.bf16.mxu0 %v347_v3  ;;  %251 = vmatprep.mubr.msk.f32.mxu0 %vm348_vm0, %v349_v6 }
   0x2   :  { %v290_v4 = vpack.c.bf16 %v23_v1, %v22_v0  ;;  %v25_v5 = vld [vmem:[%s463_s1 + $0x18] sm:$0xff]  ;;  %v109_v7 = vld [vmem:[%s465_s3] sm:$0xff]  ;;  %295 = vmatprep.subr.bf16.mxu1 %v347_v3  ;;  %v110_v8 = vld [vmem:[%s465_s3 + $0x8] sm:$0xff]  ;;  %286 = vmatprep.mubr.msk.f32.mxu1 %vm348_vm0, %v349_v6 }
   0x3   :  { %v111_v9 = vld [vmem:[%s465_s3 + $0x10] sm:$0xff]  ;;  %v112_v10 = vld [vmem:[%s465_s3 + $0x18] sm:$0xff]  ;;  %v293_v11 = vpack.c.bf16 %v25_v5, %v24_v2  ;;  %v296_v12 = vpack.c.bf16 %v110_v8, %v109_v7  ;;  %v113_v14 = vld [vmem:[%s465_s3 + $0x20] sm:$0xff] }
   0x4   :  { %291 = vmatpush3.bf16.msra.mxu0 %v290_v4  ;;  %v299_v13 = vpack.c.bf16 %v112_v10, %v111_v9  ;;  %v114_v15 = vld [vmem:[%s465_s3 + $0x28] sm:$0xff] }
   0x5   :  { %292 = vmatprep.subr.bf16.mxu0 %v347_v3  ;;  %297 = vmatpush3.bf16.msra.mxu1 %v296_v12 }
   0x6   :  { %298 = vmatprep.subr.bf16.mxu1 %v347_v3 }
   0x7   :  { %10 = vsyncpa [#allocation3], 0  ;;  %v21_v16 = vld [vmem:[%s462_s0] sm:$0xff]  ;;  %vm33_vm1 = vcmask 261120   ;;  %v302_v17 = vpack.c.bf16 %v114_v15, %v113_v14  ;;  %v115_v18 = vld [vmem:[%s465_s3 + $0x30] sm:$0xff]  ;;  %s350_s11 = smov [#allocation2]  }
   0x8   :  { %294 = vmatpush3.bf16.msra.mxu0 %v293_v11  ;;  %v116_v19 = vld [vmem:[%s465_s3 + $0x38] sm:$0xff]  ;;  %v117_v21 = vld [vmem:[%s465_s3 + $0x40] sm:$0xff]  ;;  %v118_v22 = vld [vmem:[%s465_s3 + $0x48] sm:$0xff]  ;;  %s210_s12 = sshll.u32 %s350_s11, 4  ;;  %vm202_vm2 = vcmask 130048   ;;  %s211_s12 = int_to_ptr.vmem [resolvable:$true] %s210_s12 }
   0x9   :  { %300 = vmatpush3.bf16.msra.mxu1 %v299_v13  ;;  %v305_v20 = vpack.c.bf16 %v116_v19, %v115_v18  ;;  %v308_v23 = vpack.c.bf16 %v118_v22, %v117_v21  ;;  %v119_v24 = vld [vmem:[%s465_s3 + $0x50] sm:$0xff]  ;;  %v120_v25 = vld [vmem:[%s465_s3 + $0x58] sm:$0xff]  ;;  %v121_v27 = vld [vmem:[%s465_s3 + $0x60] sm:$0xff]  ;;  %p328_p1 = scmp.lt.s32.totalorder %s211_s12, %s211_s12 }
   0xa   :  { %301 = vmatprep.subr.bf16.mxu1 %v347_v3  ;;  %v311_v26 = vpack.c.bf16 %v120_v25, %v119_v24  ;;  %v122_v28 = vld [vmem:[%s465_s3 + $0x68] sm:$0xff]  ;;  %v123_v30 = vld [vmem:[%s465_s3 + $0x70] sm:$0xff]  ;;  %v124_v31 = vld [vmem:[%s465_s3 + $0x78] sm:$0xff]  ;;  %s323_s3 = scalar_lea.vmem %s211_s12, 128 }
   0xb   :  { %252 = vmatmul.mubr.msk.f32.vlgmr.msra.gmra.mrb[0].mxu0 %vm33_vm1, %v21_v16  ;;  %v314_v29 = vpack.c.bf16 %v122_v28, %v121_v27  ;;  %v317_v32 = vpack.c.bf16 %v124_v31, %v123_v30  ;;  %v218_v33 = vld [vmem:[%s464_s2] ss:$0 sm:$0xff]  ;;  %p324_p0 = scmp.ne.s32.totalorder %s211_s12, %s323_s3  ;;  %p329_p2 = scmp.lt.s32.totalorder %s323_s3, %s323_s3 }
   0xc   :  { %v220_v39 = vld [vmem:[%s466_s4] ss:$0 sm:$0xff] }
   0xd   :  { %303 = vmatpush3.bf16.msra.mxu1 %v302_v17  ;;  %p330_p3 = por %p329_p2, %p328_p1 }
   0xe   :  { %304 = vmatprep.subr.bf16.mxu1 %v347_v3 }
   0xf   :  { %p331_p4 = pnand %p330_p3, %p324_p0 }
  0x11   :  { %306 = vmatpush3.bf16.msra.mxu1 %v305_v20 }
  0x12   :  { %307 = vmatprep.subr.bf16.mxu1 %v347_v3 }
  0x15   :  { %309 = vmatpush3.bf16.msra.mxu1 %v308_v23 }
  0x16   :  { %310 = vmatprep.subr.bf16.mxu1 %v347_v3 }
  0x19   :  { %312 = vmatpush3.bf16.msra.mxu1 %v311_v26 }
  0x1a   :  { %313 = vmatprep.subr.bf16.mxu1 %v347_v3 }
  0x1d   :  { %315 = vmatpush3.bf16.msra.mxu1 %v314_v29 }
  0x1e   :  { %316 = vmatprep.subr.bf16.mxu1 %v347_v3 }
  0x21   :  { %318 = vmatpush3.bf16.msra.mxu1 %v317_v32 }
  0xde   :  { %v103_v34 = vpop.f32.mrb[0].mxu0 }
  0xdf   :  { %v104_v35 = vadd.f32 %v218_v33, %v103_v34  ;;  %v253_v36 = vpop.f32.mrb[1].mxu0 }
  0xe1   :  { %v107_v37 = vmul.f32 0.01, %v104_v35 }
  0xe3   :  { %v108_v38 = vmax.f32 %v104_v35, %v107_v37 }
  0xe5   :  { %287 = vmatmul.mubr.f32.vlgmr.msra.gmra.mrb[0].mxu1 %v108_v38 }
 0x1b8   :  { %v198_v40 = vpop.f32.mrb[0].mxu1 }
 0x1b9   :  { %v199_v41 = vadd.f32 %v220_v39, %v198_v40  ;;  %v288_v42 = vpop.f32.mrb[1].mxu1 }
 0x1bb   :  { %203 = vst.msk [vmem:[#allocation2] sm:$0xff] %vm202_vm2, %v199_v41 }
 0x1bc   :  { %334 = shalt.err (!%p331_p4)
}
 0x1bd   :  { %s335_s14 = scalar_lea.hbm %s467_s5, 128 }
 0x1be   :  { %p336_p5 = scmp.ne.s32.totalorder %s467_s5, %s335_s14  ;;  %p339_p6 = scmp.lt.u32.totalorder %s335_s14, %s467_s5 }
 0x1c0   :  { %p341_p7 = pnand %p339_p6, %p336_p5 }
 0x1c2   :  { %344 = shalt.err (!%p341_p7)
}
 0x1c3   :  { %213 = dma.vmem_to_hbm [thread:$0]  %s211_s12, 128, %s467_s5, [#allocation3]  }
 0x1c4   :  { %345 = dma.done.wait [#allocation3], 128  }
 0x1c5   :  { %346 = vsyncadd [#allocation3], 4294967168 }
 0x1c6   :  { %217 = vsyncpa [#allocation3], 1 }

</bundles_post_ra>
